<compile_context>
chip_gen: v6e
topology: v6e:2x2x1
jax: 0.10.0
libtpu: 0.0.40
codegen_flags: <defaults>
</compile_context>

<pallas_src>
import jax
import jax.numpy as jnp
from jax.experimental import pallas as pl
from jax.experimental.pallas import tpu as pltpu


IN_DIM = 16          # X_.shape[-1] stand-in
H1, H2, H3, H4 = 32, 32, 64, 32
OUT_DIM = 1
BN_EPS = 1e-5

# Row offsets of W1..W4 inside the packed weight array (all multiples of 8).
R1 = 0
R2 = R1 + IN_DIM          # 16
R3 = R2 + H1              # 48
R4 = R3 + H2              # 80
W_ROWS = R4 + H3          # 144
W_COLS = max(H1, H2, H3, H4)   # 64

# Rows of the misc pack: b1..b4, b5 (scalar), w5^T.
MP_ROWS = 8


def _round_up(x, m):
    return ((x + m - 1) // m) * m


def regressor_kernel(x_ref, wp_ref, mp_ref, o_ref):
    """One batch tile: x (tile_b, IN_DIM) -> o (1, tile_b) (lane-dense)."""
    x = x_ref[...]                                     # (tile_b, 16)

    # Static slices of the packed parameter refs (fetched once; constant index_map).
    w1 = wp_ref[R1:R1 + IN_DIM, 0:H1]                  # (16, 32)
    w2 = wp_ref[R2:R2 + H1, 0:H2]                      # (32, 32)  (BN1 folded in)
    w3 = wp_ref[R3:R3 + H2, 0:H3]                      # (32, 64)  (BN2 folded in)
    w4 = wp_ref[R4:R4 + H3, 0:H4]                      # (64, 32)  (BN3 folded in)

    b1 = mp_ref[0:1, 0:H1]
    b2 = mp_ref[1:2, 0:H2]
    b3 = mp_ref[2:3, 0:H3]
    b4 = mp_ref[3:4, 0:H4]
    b5 = mp_ref[4:5, 0:1]                              # (1, 1)
    w5t = mp_ref[5:6, 0:H4]                            # (1, 32)  (BN4 folded, transposed)

    # Linear -> ReLU blocks (BN already folded into the following weights/bias,
    # Dropout is identity in eval mode).
    h = jnp.maximum(jnp.dot(x, w1, preferred_element_type=jnp.float32) + b1, 0.0)
    h = jnp.maximum(jnp.dot(h, w2, preferred_element_type=jnp.float32) + b2, 0.0)
    h = jnp.maximum(jnp.dot(h, w3, preferred_element_type=jnp.float32) + b3, 0.0)
    h = jnp.maximum(jnp.dot(h, w4, preferred_element_type=jnp.float32) + b4, 0.0)

    # Output head, produced lane-dense: contract the H4 axis of both operands so
    # the result is (1, tile_b) (batch along lanes) -> unmasked stores.
    o = jax.lax.dot_general(
        w5t, h,
        dimension_numbers=(((1,), (1,)), ((), ())),
        preferred_element_type=jnp.float32,
    )                                                  # (1, tile_b)
    o_ref[...] = o + b5


def pack_params(params):
    """Fold eval-mode BN into the following Linear layers and pack into 2 arrays."""
    (w1, b1, s1, t1,
     w2, b2, s2, t2,
     w3, b3, s3, t3,
     w4, b4, s4, t4,
     w5, b5) = params

    # relu(.)*s + t feeding W,b  ==  relu(.) feeding (diag(s)@W, t@W + b)
    w2f = s1.reshape(-1, 1) * w2; b2f = t1 @ w2 + b2
    w3f = s2.reshape(-1, 1) * w3; b3f = t2 @ w3 + b3
    w4f = s3.reshape(-1, 1) * w4; b4f = t3 @ w4 + b4
    w5f = s4.reshape(-1, 1) * w5; b5f = t4 @ w5 + b5      # (32, 1), (1, 1)

    wp = jnp.zeros((W_ROWS, W_COLS), jnp.float32)
    wp = wp.at[R1:R1 + IN_DIM, :H1].set(w1)
    wp = wp.at[R2:R2 + H1, :H2].set(w2f)
    wp = wp.at[R3:R3 + H2, :H3].set(w3f)
    wp = wp.at[R4:R4 + H3, :H4].set(w4f)

    mp = jnp.zeros((MP_ROWS, W_COLS), jnp.float32)
    mp = mp.at[0:1, :H1].set(b1)
    mp = mp.at[1:2, :H2].set(b2f)
    mp = mp.at[2:3, :H3].set(b3f)
    mp = mp.at[3:4, :H4].set(b4f)
    mp = mp.at[4:5, :1].set(b5f)
    mp = mp.at[5:6, :H4].set(w5f.T)
    return wp, mp


def regressor_forward(x, packed, *, tile_b=None):
    wp, mp = packed
    N, F = x.shape
    assert F == IN_DIM

    # Auto-pick a large batch tile (per-grid-step overhead ~0.35us; tiny tiles
    # would be pure pipeline overhead). Keep it a multiple of 8; if more than
    # one tile is needed, make it a multiple of 128 so the lane-dense output
    # block satisfies the (8, 128) constraint.
    if tile_b is None:
        tile_b = min(N, 1024)
    tile_b = _round_up(max(tile_b, 8), 8)
    if _round_up(N, tile_b) > tile_b:       # more than one grid step
        tile_b = _round_up(tile_b, 128)
    n_pad = _round_up(N, tile_b)
    grid = n_pad // tile_b

    if n_pad != N:
        x = jnp.pad(x, ((0, n_pad - N), (0, 0)))

    out = pl.pallas_call(
        regressor_kernel,
        out_shape=jax.ShapeDtypeStruct((1, n_pad), jnp.float32),
        grid_spec=pltpu.PrefetchScalarGridSpec(
            num_scalar_prefetch=0,
            grid=(grid,),
            in_specs=[
                pl.BlockSpec((tile_b, IN_DIM), lambda i: (i, 0)),
                pl.BlockSpec((W_ROWS, W_COLS), lambda i: (0, 0)),   # fetched once
                pl.BlockSpec((MP_ROWS, W_COLS), lambda i: (0, 0)),  # fetched once
            ],
            out_specs=pl.BlockSpec((1, tile_b), lambda i: (0, i)),
        ),
        compiler_params=pltpu.CompilerParams(
            # batch tiles are independent -> shards across both TCs on v7x
            dimension_semantics=("parallel",),
        ),
    )(x, wp, mp)

    return out[0, :N].reshape(N, OUT_DIM)


def make_params(key):
    """Deterministic synthetic parameters (weights as (in, out), BN as scale/shift)."""
    dims = [(IN_DIM, H1), (H1, H2), (H2, H3), (H3, H4), (H4, OUT_DIM)]
    keys = jax.random.split(key, 32)
    ki = iter(range(32))

    def lin(din, dout):
        w = 0.1 * jax.random.normal(keys[next(ki)], (din, dout), jnp.float32)
        b = 0.1 * jax.random.normal(keys[next(ki)], (1, dout), jnp.float32)
        return w, b

    def bn(d):
        gamma = 1.0 + 0.1 * jax.random.normal(keys[next(ki)], (1, d), jnp.float32)
        beta = 0.1 * jax.random.normal(keys[next(ki)], (1, d), jnp.float32)
        rmean = 0.1 * jax.random.normal(keys[next(ki)], (1, d), jnp.float32)
        rvar = 1.0 + jnp.abs(0.1 * jax.random.normal(keys[next(ki)], (1, d), jnp.float32))
        scale = gamma / jnp.sqrt(rvar + BN_EPS)
        shift = beta - rmean * scale
        return scale, shift

    w1, b1 = lin(*dims[0]); s1, t1 = bn(H1)
    w2, b2 = lin(*dims[1]); s2, t2 = bn(H2)
    w3, b3 = lin(*dims[2]); s3, t3 = bn(H3)
    w4, b4 = lin(*dims[3]); s4, t4 = bn(H4)
    w5, b5 = lin(*dims[4])

    return (w1, b1, s1, t1,
            w2, b2, s2, t2,
            w3, b3, s3, t3,
            w4, b4, s4, t4,
            w5, b5)


def reference_forward(x, params):
    """Un-folded JAX reference (Linear -> ReLU -> BN blocks, eval mode)."""
    (w1, b1, s1, t1,
     w2, b2, s2, t2,
     w3, b3, s3, t3,
     w4, b4, s4, t4,
     w5, b5) = params
    h = jnp.maximum(x @ w1 + b1, 0.0) * s1 + t1
    h = jnp.maximum(h @ w2 + b2, 0.0) * s2 + t2
    h = jnp.maximum(h @ w3 + b3, 0.0) * s3 + t3
    h = jnp.maximum(h @ w4 + b4, 0.0) * s4 + t4
    return h @ w5 + b5


if __name__ == "__main__":
    key = jax.random.PRNGKey(0)
    kx, kp = jax.random.split(key)

    N = 200                                  # deliberately NOT a tile multiple
    x = jax.random.normal(kx, (N, IN_DIM), jnp.float32)
    params = make_params(kp)
    packed = pack_params(params)
    ref = reference_forward(x, params)

    # Path 1: auto tile (single tile covering the whole batch).
    out_auto = jax.block_until_ready(regressor_forward(x, packed))
    # Path 2: explicit smaller tile -> multi-step grid + padded tail.
    out_tiled = jax.block_until_ready(regressor_forward(x, packed, tile_b=128))

    for out in (out_auto, out_tiled):
        assert out.shape == (N, OUT_DIM)
        assert jnp.allclose(out, ref, atol=1e-4, rtol=1e-4), "mismatch vs JAX reference"

    print("KERNEL_OK")
</pallas_src>

<mosaic_0001>
module attributes {stable_mosaic.version = 11 : i64} {
  func.func @regressor_kernel(%arg0: i32, %arg1: memref<200x16xf32, #tpu.memory_space<vmem>>, %arg2: memref<144x64xf32, #tpu.memory_space<vmem>>, %arg3: memref<8x64xf32, #tpu.memory_space<vmem>>, %arg4: memref<1x200xf32, #tpu.memory_space<vmem>>) attributes {dimension_semantics = [#tpu.dimension_semantics<parallel>], iteration_bounds = array<i64: 1>, scalar_prefetch = 0 : i64, scratch_operands = 0 : i64, tpu.core_type = #tpu.core_type<tc>, window_params = [{transform_indices = @transform_0, window_bounds = array<i64: 200, 16>}, {pipeline_mode = #tpu.pipeline_mode<synchronous>, transform_indices = @transform_1, window_bounds = array<i64: 144, 64>}, {pipeline_mode = #tpu.pipeline_mode<synchronous>, transform_indices = @transform_2, window_bounds = array<i64: 8, 64>}, {transform_indices = @transform_3, window_bounds = array<i64: 1, 200>}]} {
    %c0 = arith.constant 0 : index
    %c0_0 = arith.constant 0 : index
    %0 = vector.load %arg1[%c0, %c0_0] : memref<200x16xf32, #tpu.memory_space<vmem>>, vector<200x16xf32>
    %c0_1 = arith.constant 0 : index
    %c0_2 = arith.constant 0 : index
    %1 = vector.load %arg2[%c0_1, %c0_2] : memref<144x64xf32, #tpu.memory_space<vmem>>, vector<16x32xf32>
    %c16 = arith.constant 16 : index
    %c0_3 = arith.constant 0 : index
    %2 = vector.load %arg2[%c16, %c0_3] : memref<144x64xf32, #tpu.memory_space<vmem>>, vector<32x32xf32>
    %c48 = arith.constant 48 : index
    %c0_4 = arith.constant 0 : index
    %3 = vector.load %arg2[%c48, %c0_4] : memref<144x64xf32, #tpu.memory_space<vmem>>, vector<32x64xf32>
    %c80 = arith.constant 80 : index
    %c0_5 = arith.constant 0 : index
    %4 = vector.load %arg2[%c80, %c0_5] : memref<144x64xf32, #tpu.memory_space<vmem>>, vector<64x32xf32>
    %c0_6 = arith.constant 0 : index
    %c0_7 = arith.constant 0 : index
    %5 = vector.load %arg3[%c0_6, %c0_7] : memref<8x64xf32, #tpu.memory_space<vmem>>, vector<1x32xf32>
    %c1 = arith.constant 1 : index
    %c0_8 = arith.constant 0 : index
    %6 = vector.load %arg3[%c1, %c0_8] : memref<8x64xf32, #tpu.memory_space<vmem>>, vector<1x32xf32>
    %c2 = arith.constant 2 : index
    %c0_9 = arith.constant 0 : index
    %7 = vector.load %arg3[%c2, %c0_9] : memref<8x64xf32, #tpu.memory_space<vmem>>, vector<1x64xf32>
    %c3 = arith.constant 3 : index
    %c0_10 = arith.constant 0 : index
    %8 = vector.load %arg3[%c3, %c0_10] : memref<8x64xf32, #tpu.memory_space<vmem>>, vector<1x32xf32>
    %c4 = arith.constant 4 : index
    %c0_11 = arith.constant 0 : index
    %9 = vector.load %arg3[%c4, %c0_11] : memref<8x64xf32, #tpu.memory_space<vmem>>, vector<1x1xf32>
    %c5 = arith.constant 5 : index
    %c0_12 = arith.constant 0 : index
    %10 = vector.load %arg3[%c5, %c0_12] : memref<8x64xf32, #tpu.memory_space<vmem>>, vector<1x32xf32>
    %cst = arith.constant dense<0.000000e+00> : vector<200x32xf32>
    %11 = tpu.matmul %0, %1, %cst {dimension_numbers = #tpu.dot_dimension_numbers<[1], [0], [0], [1], [0, 0, 1, 1], [], []>} : vector<200x16xf32>, vector<16x32xf32>, vector<200x32xf32> -> vector<200x32xf32>
    %12 = vector.broadcast %5 : vector<1x32xf32> to vector<200x32xf32>
    %13 = arith.addf %11, %12 : vector<200x32xf32>
    %cst_13 = arith.constant 0.000000e+00 : f32
    %14 = vector.broadcast %cst_13 : f32 to vector<200x32xf32>
    %15 = arith.maximumf %13, %14 : vector<200x32xf32>
    %cst_14 = arith.constant dense<0.000000e+00> : vector<200x32xf32>
    %16 = tpu.matmul %15, %2, %cst_14 {dimension_numbers = #tpu.dot_dimension_numbers<[1], [0], [0], [1], [0, 0, 1, 1], [], []>} : vector<200x32xf32>, vector<32x32xf32>, vector<200x32xf32> -> vector<200x32xf32>
    %17 = vector.broadcast %6 : vector<1x32xf32> to vector<200x32xf32>
    %18 = arith.addf %16, %17 : vector<200x32xf32>
    %cst_15 = arith.constant 0.000000e+00 : f32
    %19 = vector.broadcast %cst_15 : f32 to vector<200x32xf32>
    %20 = arith.maximumf %18, %19 : vector<200x32xf32>
    %cst_16 = arith.constant dense<0.000000e+00> : vector<200x64xf32>
    %21 = tpu.matmul %20, %3, %cst_16 {dimension_numbers = #tpu.dot_dimension_numbers<[1], [0], [0], [1], [0, 0, 1, 1], [], []>} : vector<200x32xf32>, vector<32x64xf32>, vector<200x64xf32> -> vector<200x64xf32>
    %22 = vector.broadcast %7 : vector<1x64xf32> to vector<200x64xf32>
    %23 = arith.addf %21, %22 : vector<200x64xf32>
    %cst_17 = arith.constant 0.000000e+00 : f32
    %24 = vector.broadcast %cst_17 : f32 to vector<200x64xf32>
    %25 = arith.maximumf %23, %24 : vector<200x64xf32>
    %cst_18 = arith.constant dense<0.000000e+00> : vector<200x32xf32>
    %26 = tpu.matmul %25, %4, %cst_18 {dimension_numbers = #tpu.dot_dimension_numbers<[1], [0], [0], [1], [0, 0, 1, 1], [], []>} : vector<200x64xf32>, vector<64x32xf32>, vector<200x32xf32> -> vector<200x32xf32>
    %27 = vector.broadcast %8 : vector<1x32xf32> to vector<200x32xf32>
    %28 = arith.addf %26, %27 : vector<200x32xf32>
    %cst_19 = arith.constant 0.000000e+00 : f32
    %29 = vector.broadcast %cst_19 : f32 to vector<200x32xf32>
    %30 = arith.maximumf %28, %29 : vector<200x32xf32>
    %cst_20 = arith.constant dense<0.000000e+00> : vector<1x200xf32>
    %31 = tpu.matmul %10, %30, %cst_20 {dimension_numbers = #tpu.dot_dimension_numbers<[1], [1], [0], [0], [0, 0, 1, 0], [], []>} : vector<1x32xf32>, vector<200x32xf32>, vector<1x200xf32> -> vector<1x200xf32>
    %32 = vector.broadcast %9 : vector<1x1xf32> to vector<1x200xf32>
    %33 = arith.addf %31, %32 : vector<1x200xf32>
    %c0_21 = arith.constant 0 : index
    %c0_22 = arith.constant 0 : index
    %34 = vector.load %arg4[%c0_21, %c0_22] : memref<1x200xf32, #tpu.memory_space<vmem>>, vector<1x200xf32>
    tpu.vector_store %arg4[%c0_21, %c0_22], %33 {strides = array<i32>} : memref<1x200xf32, #tpu.memory_space<vmem>>, vector<1x200xf32>,
    return
  }
  func.func @transform_0(%arg0: i32) -> (i32, i32) {
    %c0_i32 = arith.constant 0 : i32
    %c0_i32_0 = arith.constant 0 : i32
    return %arg0, %c0_i32 : i32, i32
  }
  func.func @transform_1(%arg0: i32) -> (i32, i32) {
    %c0_i32 = arith.constant 0 : i32
    %c0_i32_0 = arith.constant 0 : i32
    %c0_i32_1 = arith.constant 0 : i32
    return %c0_i32, %c0_i32_0 : i32, i32
  }
  func.func @transform_2(%arg0: i32) -> (i32, i32) {
    %c0_i32 = arith.constant 0 : i32
    %c0_i32_0 = arith.constant 0 : i32
    %c0_i32_1 = arith.constant 0 : i32
    return %c0_i32, %c0_i32_0 : i32, i32
  }
  func.func @transform_3(%arg0: i32) -> (i32, i32) {
    %c0_i32 = arith.constant 0 : i32
    %c0_i32_0 = arith.constant 0 : i32
    return %c0_i32, %arg0 : i32, i32
  }
}

</mosaic_0001>

<bundles_post_ra>
// kernel: tpu_custom_call.1
= control target key start
LH: loop header
LB: loop body
LE: loop exit
PB: predicated region body
PF: predicated region fallthrough
CT: control target
= control target key end

     0   :  { %v2046_v1 = vmov 0.0   ;;  %vm2047_vm0 = vmmov 0   ;;  %vm68_vm1 = vcmask 130048   ;;  %s2738_s0 = inlined_call_operand.vmem [shape: f32[200,16], index: 0, kind: input, shape index: {}]   ;;  %s2739_s1 = inlined_call_operand.vmem [shape: f32[144,64], index: 1, kind: input, shape index: {}]   ;;  %s2740_s2 = inlined_call_operand.vmem [shape: f32[8,64], index: 2, kind: input, shape index: {}]   ;;  %s2741_s3 = inlined_call_operand.hbm [shape: f32[1,200], index: 3, kind: output, shape index: {}]  }
   0x1   :  { %v41_v0 = vld [vmem:[%s2739_s1 + $0x8] sm:$0xff]  ;;  %1682 = vmatprep.subr.mxu0 %v2046_v1  ;;  %v40_v2 = vld [vmem:[%s2739_s1] sm:$0xff]  ;;  %1686 = vmatprep.mubr.msk.f32.mxu0 %vm2047_vm0, %v2046_v1 }
   0x2   :  { %1683 = vmatpush3.msra.mxu0 %v41_v0  ;;  %v15_v3 = vld [vmem:[%s2738_s0] sm:$0xff]  ;;  %1761 = vmatprep.subr.mxu1 %v2046_v1  ;;  %v16_v4 = vld [vmem:[%s2738_s0 + $0x8] sm:$0xff] }
   0x3   :  { %1684 = vmatprep.subr.mxu0 %v2046_v1  ;;  %1769 = vmatprep.mubr.msk.f32.mxu1 %vm2047_vm0, %v2046_v1  ;;  %v45_v5 = vld [vmem:[%s2739_s1 + $0x28] sm:$0xff] }
   0x4   :  { %1685 = vmatpush3.msra.mxu0 %v40_v2 }
   0x5   :  { %1687 = vmatmul.mubr.msk.f32.vlgmr.msra.gmra.mxu0 %vm68_vm1, %v15_v3  ;;  %1844 = vmatprep.subr.mxu0 %v2046_v1 }
   0x6   :  { %1689 = vmatprep.mubr.msk.f32.mxu0 %vm2047_vm0, %v2046_v1 }
   0x9   :  { %1690 = vmatmul.mubr.msk.f32.gmra.mxu0 %vm68_vm1, %v16_v4 }
   0xa   :  { %8 = vsyncpa [#allocation3], 0  ;;  %1692 = vmatprep.mubr.msk.f32.mxu0 %vm2047_vm0, %v2046_v1  ;;  %v17_v6 = vld [vmem:[%s2738_s0 + $0x10] sm:$0xff]  ;;  %1762 = vmatpush3.msra.mxu1 %v45_v5  ;;  %v18_v7 = vld [vmem:[%s2738_s0 + $0x18] sm:$0xff]  ;;  %vm363_vm2 = vcmask 261120   ;;  %vm952_vm3 = vcmask 523264  }
   0xb   :  { %1763 = vmatprep.subr.mxu1 %v2046_v1  ;;  %v19_v8 = vld [vmem:[%s2738_s0 + $0x20] sm:$0xff]  ;;  %v20_v9 = vld [vmem:[%s2738_s0 + $0x28] sm:$0xff]  ;;  %v21_v10 = vld [vmem:[%s2738_s0 + $0x30] sm:$0xff]  ;;  %s2050_s26 = smov [#allocation2]  }
   0xc   :  { %v22_v11 = vld [vmem:[%s2738_s0 + $0x38] sm:$0xff]  ;;  %v23_v12 = vld [vmem:[%s2738_s0 + $0x40] sm:$0xff]  ;;  %v24_v13 = vld [vmem:[%s2738_s0 + $0x48] sm:$0xff]  ;;  %s1426_s27 = sshll.u32 %s2050_s26, 4  ;;  %s1427_s27 = int_to_ptr.vmem [resolvable:$true] %s1426_s27 }
   0xd   :  { %1693 = vmatmul.mubr.msk.f32.gmra.mxu0 %vm68_vm1, %v17_v6  ;;  %v25_v14 = vld [vmem:[%s2738_s0 + $0x50] sm:$0xff]  ;;  %v26_v15 = vld [vmem:[%s2738_s0 + $0x58] sm:$0xff]  ;;  %v27_v16 = vld [vmem:[%s2738_s0 + $0x60] sm:$0xff]  ;;  %p2029_p1 = scmp.lt.s32.totalorder %s1427_s27, %s1427_s27 }
   0xe   :  { %1695 = vmatprep.mubr.msk.f32.mxu0 %vm2047_vm0, %v2046_v1  ;;  %v28_v17 = vld [vmem:[%s2738_s0 + $0x68] sm:$0xff]  ;;  %v29_v18 = vld [vmem:[%s2738_s0 + $0x70] sm:$0xff]  ;;  %v30_v19 = vld [vmem:[%s2738_s0 + $0x78] sm:$0xff] }
   0xf   :  { %v31_v20 = vld [vmem:[%s2738_s0 + $0x80] sm:$0xff]  ;;  %v32_v22 = vld [vmem:[%s2738_s0 + $0x88] sm:$0xff]  ;;  %v43_v23 = vld [vmem:[%s2739_s1 + $0x18] sm:$0xff] }
  0x10   :  { %v44_v21 = vld [vmem:[%s2739_s1 + $0x20] sm:$0xff]  ;;  %v42_v24 = vld [vmem:[%s2739_s1 + $0x10] sm:$0xff]  ;;  %v34_v26 = vld [vmem:[%s2738_s0 + $0x98] sm:$0xff] }
  0x11   :  { %1696 = vmatmul.mubr.msk.f32.gmra.mxu0 %vm68_vm1, %v18_v7  ;;  %1764 = vmatpush3.msra.mxu1 %v44_v21  ;;  %v33_v25 = vld [vmem:[%s2738_s0 + $0x90] sm:$0xff]  ;;  %v35_v27 = vld [vmem:[%s2738_s0 + $0xa0] sm:$0xff]  ;;  %v36_v28 = vld [vmem:[%s2738_s0 + $0xa8] sm:$0xff] }
  0x12   :  { %1698 = vmatprep.mubr.msk.f32.mxu0 %vm2047_vm0, %v2046_v1  ;;  %1765 = vmatprep.subr.mxu1 %v2046_v1  ;;  %v37_v29 = vld [vmem:[%s2738_s0 + $0xb0] sm:$0xff]  ;;  %v38_v30 = vld [vmem:[%s2738_s0 + $0xb8] sm:$0xff]  ;;  %v39_v31 = vld [vmem:[%s2738_s0 + $0xc0] sm:$0xff] }
  0x13   :  { %1766 = vmatpush3.msra.mxu1 %v43_v23  ;;  %v49_v32 = vld [vmem:[%s2739_s1 + $0x48] sm:$0xff]  ;;  %v48_v33 = vld [vmem:[%s2739_s1 + $0x40] sm:$0xff]  ;;  %v47_v34 = vld [vmem:[%s2739_s1 + $0x38] sm:$0xff] }
  0x14   :  { %1767 = vmatprep.subr.mxu1 %v2046_v1  ;;  %1845 = vmatpush3.msra.mxu0 %v49_v32  ;;  %v46_v35 = vld [vmem:[%s2739_s1 + $0x30] sm:$0xff]  ;;  %v2270_v36 = vld [vmem:[%s2740_s2] ss:$0 sm:$0xff] }
  0x15   :  { %1699 = vmatmul.mubr.msk.f32.gmra.mxu0 %vm68_vm1, %v19_v8  ;;  %1768 = vmatpush3.msra.mxu1 %v42_v24 }
  0x16   :  { %1701 = vmatprep.mubr.msk.f32.mxu0 %vm2047_vm0, %v2046_v1  ;;  %1927 = vmatprep.subr.mxu1 %v2046_v1 }
  0x17   :  { %1846 = vmatprep.subr.mxu0 %v2046_v1 }
  0x18   :  { %1847 = vmatpush3.msra.mxu0 %v48_v33 }
  0x19   :  { %1702 = vmatmul.mubr.msk.f32.gmra.mxu0 %vm68_vm1, %v20_v9  ;;  %1848 = vmatprep.subr.mxu0 %v2046_v1 }
  0x1a   :  { %1704 = vmatprep.mubr.msk.f32.mxu0 %vm2047_vm0, %v2046_v1  ;;  %1849 = vmatpush3.msra.mxu0 %v47_v34 }
  0x1b   :  { %1850 = vmatprep.subr.mxu0 %v2046_v1 }
  0x1c   :  { %1851 = vmatpush3.msra.mxu0 %v46_v35 }
  0x1d   :  { %1705 = vmatmul.mubr.msk.f32.gmra.mxu0 %vm68_vm1, %v21_v10  ;;  %1326 = vmatprep.subr.mxu0 %v2046_v1 }
  0x1e   :  { %1707 = vmatprep.mubr.msk.f32.mxu0 %vm2047_vm0, %v2046_v1 }
  0x21   :  { %1708 = vmatmul.mubr.msk.f32.gmra.mxu0 %vm68_vm1, %v22_v11 }
  0x22   :  { %1710 = vmatprep.mubr.msk.f32.mxu0 %vm2047_vm0, %v2046_v1 }
  0x25   :  { %1711 = vmatmul.mubr.msk.f32.gmra.mxu0 %vm68_vm1, %v23_v12 }
  0x26   :  { %1713 = vmatprep.mubr.msk.f32.mxu0 %vm2047_vm0, %v2046_v1 }
  0x29   :  { %1714 = vmatmul.mubr.msk.f32.gmra.mxu0 %vm68_vm1, %v24_v13 }
  0x2a   :  { %1716 = vmatprep.mubr.msk.f32.mxu0 %vm2047_vm0, %v2046_v1 }
  0x2d   :  { %1717 = vmatmul.mubr.msk.f32.gmra.mxu0 %vm68_vm1, %v25_v14 }
  0x2e   :  { %1719 = vmatprep.mubr.msk.f32.mxu0 %vm2047_vm0, %v2046_v1 }
  0x31   :  { %1720 = vmatmul.mubr.msk.f32.gmra.mxu0 %vm68_vm1, %v26_v15 }
  0x32   :  { %1722 = vmatprep.mubr.msk.f32.mxu0 %vm2047_vm0, %v2046_v1 }
  0x35   :  { %1723 = vmatmul.mubr.msk.f32.gmra.mxu0 %vm68_vm1, %v27_v16 }
  0x36   :  { %1725 = vmatprep.mubr.msk.f32.mxu0 %vm2047_vm0, %v2046_v1 }
  0x39   :  { %1726 = vmatmul.mubr.msk.f32.gmra.mxu0 %vm68_vm1, %v28_v17 }
  0x3a   :  { %1728 = vmatprep.mubr.msk.f32.mxu0 %vm2047_vm0, %v2046_v1 }
  0x3d   :  { %1729 = vmatmul.mubr.msk.f32.gmra.mxu0 %vm68_vm1, %v29_v18 }
  0x3e   :  { %1731 = vmatprep.mubr.msk.f32.mxu0 %vm2047_vm0, %v2046_v1 }
  0x41   :  { %1732 = vmatmul.mubr.msk.f32.gmra.mxu0 %vm68_vm1, %v30_v19 }
  0x42   :  { %1734 = vmatprep.mubr.msk.f32.mxu0 %vm2047_vm0, %v2046_v1 }
  0x45   :  { %1735 = vmatmul.mubr.msk.f32.gmra.mxu0 %vm68_vm1, %v31_v20 }
  0x46   :  { %1737 = vmatprep.mubr.msk.f32.mxu0 %vm2047_vm0, %v2046_v1 }
  0x49   :  { %1738 = vmatmul.mubr.msk.f32.gmra.mxu0 %vm68_vm1, %v32_v22 }
  0x4a   :  { %1740 = vmatprep.mubr.msk.f32.mxu0 %vm2047_vm0, %v2046_v1 }
  0x4d   :  { %1741 = vmatmul.mubr.msk.f32.gmra.mxu0 %vm68_vm1, %v33_v25 }
  0x4e   :  { %1743 = vmatprep.mubr.msk.f32.mxu0 %vm2047_vm0, %v2046_v1 }
  0x51   :  { %1744 = vmatmul.mubr.msk.f32.gmra.mxu0 %vm68_vm1, %v34_v26 }
  0x52   :  { %1746 = vmatprep.mubr.msk.f32.mxu0 %vm2047_vm0, %v2046_v1 }
  0x55   :  { %1747 = vmatmul.mubr.msk.f32.gmra.mxu0 %vm68_vm1, %v35_v27 }
  0x56   :  { %1749 = vmatprep.mubr.msk.f32.mxu0 %vm2047_vm0, %v2046_v1 }
  0x59   :  { %1750 = vmatmul.mubr.msk.f32.gmra.mxu0 %vm68_vm1, %v36_v28 }
  0x5a   :  { %1752 = vmatprep.mubr.msk.f32.mxu0 %vm2047_vm0, %v2046_v1 }
  0x5d   :  { %1753 = vmatmul.mubr.msk.f32.gmra.mxu0 %vm68_vm1, %v37_v29 }
  0x5e   :  { %1755 = vmatprep.mubr.msk.f32.mxu0 %vm2047_vm0, %v2046_v1 }
  0x61   :  { %1756 = vmatmul.mubr.msk.f32.gmra.mxu0 %vm68_vm1, %v38_v30 }
  0x62   :  { %1758 = vmatprep.mubr.msk.f32.mxu0 %vm2047_vm0, %v2046_v1 }
  0x65   :  { %1759 = vmatmul.mubr.msk.f32.gmra.mxu0 %vm68_vm1, %v39_v31 }
  0x66   :  { %1852 = vmatprep.mubr.msk.f32.mxu0 %vm2047_vm0, %v2046_v1 }
  0xc5   :  { %v210_v37 = vpop.f32.mrf.mxu0 }
  0xc6   :  { %v211_v38 = vadd.f32 %v2270_v36, %v210_v37 }
  0xc7   :  { %v1688_v39 = vpop.f32.mrf.mxu0 }
  0xc8   :  { %v334_v40 = vmax.f32 %v211_v38, 0.0 }
  0xc9   :  { %v215_v41 = vpop.f32.mrf.mxu0 }
  0xca   :  { %v216_v42 = vadd.f32 %v2270_v36, %v215_v41  ;;  %1770 = vmatmul.mubr.msk.f32.vlgmr.msra.gmra.mxu1 %vm363_vm2, %v334_v40 }
  0xcb   :  { %v1691_v43 = vpop.f32.mrf.mxu0  ;;  %1772 = vmatprep.mubr.msk.f32.mxu1 %vm2047_vm0, %v2046_v1 }
  0xcc   :  { %v335_v44 = vmax.f32 %v216_v42, 0.0 }
  0xcd   :  { %v220_v45 = vpop.f32.mrf.mxu0 }
  0xce   :  { %v221_v46 = vadd.f32 %v2270_v36, %v220_v45  ;;  %1773 = vmatmul.mubr.msk.f32.gmra.mxu1 %vm363_vm2, %v335_v44 }
  0xcf   :  { %v1694_v47 = vpop.f32.mrf.mxu0  ;;  %1775 = vmatprep.mubr.msk.f32.mxu1 %vm2047_vm0, %v2046_v1 }
  0xd0   :  { %v336_v48 = vmax.f32 %v221_v46, 0.0 }
  0xd1   :  { %v225_v49 = vpop.f32.mrf.mxu0 }
  0xd2   :  { %v226_v50 = vadd.f32 %v2270_v36, %v225_v49  ;;  %1776 = vmatmul.mubr.msk.f32.gmra.mxu1 %vm363_vm2, %v336_v48 }
  0xd3   :  { %v1697_v51 = vpop.f32.mrf.mxu0  ;;  %1778 = vmatprep.mubr.msk.f32.mxu1 %vm2047_vm0, %v2046_v1 }
  0xd4   :  { %v337_v52 = vmax.f32 %v226_v50, 0.0 }
  0xd5   :  { %v230_v53 = vpop.f32.mrf.mxu0 }
  0xd6   :  { %v231_v54 = vadd.f32 %v2270_v36, %v230_v53  ;;  %1779 = vmatmul.mubr.msk.f32.gmra.mxu1 %vm363_vm2, %v337_v52 }
  0xd7   :  { %v1700_v55 = vpop.f32.mrf.mxu0  ;;  %1781 = vmatprep.mubr.msk.f32.mxu1 %vm2047_vm0, %v2046_v1 }
  0xd8   :  { %v338_v56 = vmax.f32 %v231_v54, 0.0 }
  0xd9   :  { %v235_v57 = vpop.f32.mrf.mxu0 }
  0xda   :  { %v236_v58 = vadd.f32 %v2270_v36, %v235_v57  ;;  %1782 = vmatmul.mubr.msk.f32.gmra.mxu1 %vm363_vm2, %v338_v56 }
  0xdb   :  { %v1703_v59 = vpop.f32.mrf.mxu0  ;;  %1784 = vmatprep.mubr.msk.f32.mxu1 %vm2047_vm0, %v2046_v1 }
  0xdc   :  { %v339_v60 = vmax.f32 %v236_v58, 0.0 }
  0xdd   :  { %v240_v61 = vpop.f32.mrf.mxu0 }
  0xde   :  { %v241_v62 = vadd.f32 %v2270_v36, %v240_v61  ;;  %1785 = vmatmul.mubr.msk.f32.gmra.mxu1 %vm363_vm2, %v339_v60 }
  0xdf   :  { %v1706_v63 = vpop.f32.mrf.mxu0  ;;  %1787 = vmatprep.mubr.msk.f32.mxu1 %vm2047_vm0, %v2046_v1 }
  0xe0   :  { %v340_v0 = vmax.f32 %v241_v62, 0.0 }
  0xe1   :  { %v245_v2 = vpop.f32.mrf.mxu0 }
  0xe2   :  { %v246_v3 = vadd.f32 %v2270_v36, %v245_v2  ;;  %1788 = vmatmul.mubr.msk.f32.gmra.mxu1 %vm363_vm2, %v340_v0 }
  0xe3   :  { %v1709_v4 = vpop.f32.mrf.mxu0  ;;  %1790 = vmatprep.mubr.msk.f32.mxu1 %vm2047_vm0, %v2046_v1 }
  0xe4   :  { %v341_v5 = vmax.f32 %v246_v3, 0.0 }
  0xe5   :  { %v250_v6 = vpop.f32.mrf.mxu0 }
  0xe6   :  { %v251_v7 = vadd.f32 %v2270_v36, %v250_v6  ;;  %1791 = vmatmul.mubr.msk.f32.gmra.mxu1 %vm363_vm2, %v341_v5 }
  0xe7   :  { %v1712_v8 = vpop.f32.mrf.mxu0  ;;  %1793 = vmatprep.mubr.msk.f32.mxu1 %vm2047_vm0, %v2046_v1 }
  0xe8   :  { %v342_v9 = vmax.f32 %v251_v7, 0.0 }
  0xe9   :  { %v255_v10 = vpop.f32.mrf.mxu0 }
  0xea   :  { %v256_v11 = vadd.f32 %v2270_v36, %v255_v10  ;;  %1794 = vmatmul.mubr.msk.f32.gmra.mxu1 %vm363_vm2, %v342_v9 }
  0xeb   :  { %v1715_v12 = vpop.f32.mrf.mxu0  ;;  %1796 = vmatprep.mubr.msk.f32.mxu1 %vm2047_vm0, %v2046_v1 }
  0xec   :  { %v343_v13 = vmax.f32 %v256_v11, 0.0  ;;  %v57_v12 = vld [vmem:[%s2739_s1 + $0x88] sm:$0xff] }
  0xed   :  { %v260_v14 = vpop.f32.mrf.mxu0  ;;  %1928 = vmatpush3.msra.mxu1 %v57_v12 }
  0xee   :  { %v261_v15 = vadd.f32 %v2270_v36, %v260_v14  ;;  %1797 = vmatmul.mubr.msk.f32.gmra.mxu1 %vm363_vm2, %v343_v13  ;;  %1929 = vmatprep.subr.mxu1 %v2046_v1  ;;  %v55_v13 = vld [vmem:[%s2739_s1 + $0x78] sm:$0xff]  ;;  %v54_v14 = vld [vmem:[%s2739_s1 + $0x70] sm:$0xff] }
  0xef   :  { %v1718_v16 = vpop.f32.mrf.mxu0  ;;  %1799 = vmatprep.mubr.msk.f32.mxu1 %vm2047_vm0, %v2046_v1 }
  0xf0   :  { %v344_v17 = vmax.f32 %v261_v15, 0.0  ;;  %v53_v15 = vld [vmem:[%s2739_s1 + $0x68] sm:$0xff]  ;;  %v52_v16 = vld [vmem:[%s2739_s1 + $0x60] sm:$0xff] }
  0xf1   :  { %v265_v18 = vpop.f32.mrf.mxu0 }
  0xf2   :  { %v266_v19 = vadd.f32 %v2270_v36, %v265_v18  ;;  %1800 = vmatmul.mubr.msk.f32.gmra.mxu1 %vm363_vm2, %v344_v17  ;;  %v51_v17 = vld [vmem:[%s2739_s1 + $0x58] sm:$0xff]  ;;  %v50_v18 = vld [vmem:[%s2739_s1 + $0x50] sm:$0xff] }
  0xf3   :  { %v1721_v20 = vpop.f32.mrf.mxu0  ;;  %1802 = vmatprep.mubr.msk.f32.mxu1 %vm2047_vm0, %v2046_v1 }
  0xf4   :  { %v345_v21 = vmax.f32 %v266_v19, 0.0  ;;  %v2406_v19 = vld [vmem:[%s2740_s2 + $0x1] ss:$0 sm:$0xff] }
  0xf5   :  { %v270_v22 = vpop.f32.mrf.mxu0 }
  0xf6   :  { %v271_v23 = vadd.f32 %v2270_v36, %v270_v22  ;;  %1803 = vmatmul.mubr.msk.f32.gmra.mxu1 %vm363_vm2, %v345_v21 }
  0xf7   :  { %v1724_v24 = vpop.f32.mrf.mxu0  ;;  %1805 = vmatprep.mubr.msk.f32.mxu1 %vm2047_vm0, %v2046_v1 }
  0xf8   :  { %v346_v25 = vmax.f32 %v271_v23, 0.0 }
  0xf9   :  { %v275_v26 = vpop.f32.mrf.mxu0 }
  0xfa   :  { %v276_v27 = vadd.f32 %v2270_v36, %v275_v26  ;;  %1806 = vmatmul.mubr.msk.f32.gmra.mxu1 %vm363_vm2, %v346_v25 }
  0xfb   :  { %v1727_v28 = vpop.f32.mrf.mxu0  ;;  %1808 = vmatprep.mubr.msk.f32.mxu1 %vm2047_vm0, %v2046_v1 }
  0xfc   :  { %v347_v29 = vmax.f32 %v276_v27, 0.0 }
  0xfd   :  { %v280_v30 = vpop.f32.mrf.mxu0 }
  0xfe   :  { %v281_v31 = vadd.f32 %v2270_v36, %v280_v30  ;;  %1809 = vmatmul.mubr.msk.f32.gmra.mxu1 %vm363_vm2, %v347_v29 }
  0xff   :  { %v1730_v32 = vpop.f32.mrf.mxu0  ;;  %1811 = vmatprep.mubr.msk.f32.mxu1 %vm2047_vm0, %v2046_v1 }
 0x100   :  { %v348_v33 = vmax.f32 %v281_v31, 0.0 }
 0x101   :  { %v285_v34 = vpop.f32.mrf.mxu0 }
 0x102   :  { %v286_v35 = vadd.f32 %v2270_v36, %v285_v34  ;;  %1812 = vmatmul.mubr.msk.f32.gmra.mxu1 %vm363_vm2, %v348_v33 }
 0x103   :  { %v1733_v37 = vpop.f32.mrf.mxu0  ;;  %1814 = vmatprep.mubr.msk.f32.mxu1 %vm2047_vm0, %v2046_v1 }
 0x104   :  { %v349_v38 = vmax.f32 %v286_v35, 0.0 }
 0x105   :  { %v290_v39 = vpop.f32.mrf.mxu0 }
 0x106   :  { %1815 = vmatmul.mubr.msk.f32.gmra.mxu1 %vm363_vm2, %v349_v38  ;;  %v291_v40 = vadd.f32 %v2270_v36, %v290_v39 }
 0x107   :  { %v1736_v41 = vpop.f32.mrf.mxu0  ;;  %1817 = vmatprep.mubr.msk.f32.mxu1 %vm2047_vm0, %v2046_v1 }
 0x108   :  { %v350_v42 = vmax.f32 %v291_v40, 0.0 }
 0x109   :  { %v295_v43 = vpop.f32.mrf.mxu0 }
 0x10a   :  { %v296_v44 = vadd.f32 %v2270_v36, %v295_v43  ;;  %1818 = vmatmul.mubr.msk.f32.gmra.mxu1 %vm363_vm2, %v350_v42 }
 0x10b   :  { %v1739_v45 = vpop.f32.mrf.mxu0  ;;  %1820 = vmatprep.mubr.msk.f32.mxu1 %vm2047_vm0, %v2046_v1 }
 0x10c   :  { %v351_v46 = vmax.f32 %v296_v44, 0.0 }
 0x10d   :  { %v300_v47 = vpop.f32.mrf.mxu0 }
 0x10e   :  { %v301_v48 = vadd.f32 %v2270_v36, %v300_v47  ;;  %1821 = vmatmul.mubr.msk.f32.gmra.mxu1 %vm363_vm2, %v351_v46 }
 0x10f   :  { %v1742_v49 = vpop.f32.mrf.mxu0  ;;  %1823 = vmatprep.mubr.msk.f32.mxu1 %vm2047_vm0, %v2046_v1 }
 0x110   :  { %v352_v50 = vmax.f32 %v301_v48, 0.0 }
 0x111   :  { %v305_v51 = vpop.f32.mrf.mxu0 }
 0x112   :  { %v306_v52 = vadd.f32 %v2270_v36, %v305_v51  ;;  %1824 = vmatmul.mubr.msk.f32.gmra.mxu1 %vm363_vm2, %v352_v50 }
 0x113   :  { %v1745_v53 = vpop.f32.mrf.mxu0  ;;  %1826 = vmatprep.mubr.msk.f32.mxu1 %vm2047_vm0, %v2046_v1 }
 0x114   :  { %v353_v54 = vmax.f32 %v306_v52, 0.0 }
 0x115   :  { %v310_v55 = vpop.f32.mrf.mxu0 }
 0x116   :  { %v311_v56 = vadd.f32 %v2270_v36, %v310_v55  ;;  %1827 = vmatmul.mubr.msk.f32.gmra.mxu1 %vm363_vm2, %v353_v54 }
 0x117   :  { %v1748_v57 = vpop.f32.mrf.mxu0  ;;  %1829 = vmatprep.mubr.msk.f32.mxu1 %vm2047_vm0, %v2046_v1 }
 0x118   :  { %v354_v58 = vmax.f32 %v311_v56, 0.0 }
 0x119   :  { %v315_v59 = vpop.f32.mrf.mxu0 }
 0x11a   :  { %v316_v60 = vadd.f32 %v2270_v36, %v315_v59  ;;  %1830 = vmatmul.mubr.msk.f32.gmra.mxu1 %vm363_vm2, %v354_v58 }
 0x11b   :  { %v1751_v61 = vpop.f32.mrf.mxu0  ;;  %1832 = vmatprep.mubr.msk.f32.mxu1 %vm2047_vm0, %v2046_v1 }
 0x11c   :  { %v355_v62 = vmax.f32 %v316_v60, 0.0 }
 0x11d   :  { %v320_v63 = vpop.f32.mrf.mxu0 }
 0x11e   :  { %v321_v0 = vadd.f32 %v2270_v36, %v320_v63  ;;  %1833 = vmatmul.mubr.msk.f32.gmra.mxu1 %vm363_vm2, %v355_v62 }
 0x11f   :  { %v1754_v2 = vpop.f32.mrf.mxu0  ;;  %1835 = vmatprep.mubr.msk.f32.mxu1 %vm2047_vm0, %v2046_v1 }
 0x120   :  { %v356_v3 = vmax.f32 %v321_v0, 0.0 }
 0x121   :  { %v325_v4 = vpop.f32.mrf.mxu0 }
 0x122   :  { %v326_v5 = vadd.f32 %v2270_v36, %v325_v4  ;;  %1836 = vmatmul.mubr.msk.f32.gmra.mxu1 %vm363_vm2, %v356_v3 }
 0x123   :  { %v1757_v6 = vpop.f32.mrf.mxu0  ;;  %1838 = vmatprep.mubr.msk.f32.mxu1 %vm2047_vm0, %v2046_v1 }
 0x124   :  { %v357_v7 = vmax.f32 %v326_v5, 0.0 }
 0x125   :  { %v330_v8 = vpop.f32.mrf.mxu0 }
 0x126   :  { %v331_v9 = vadd.f32 %v2270_v36, %v330_v8  ;;  %1839 = vmatmul.mubr.msk.f32.gmra.mxu1 %vm363_vm2, %v357_v7  ;;  %v56_v36 = vld [vmem:[%s2739_s1 + $0x80] sm:$0xff] }
 0x127   :  { %v1760_v10 = vpop.f32.mrf.mxu0  ;;  %1841 = vmatprep.mubr.msk.f32.mxu1 %vm2047_vm0, %v2046_v1  ;;  %1930 = vmatpush3.msra.mxu1 %v56_v36 }
 0x128   :  { %v358_v11 = vmax.f32 %v331_v9, 0.0  ;;  %1931 = vmatprep.subr.mxu1 %v2046_v1 }
 0x129   :  { %1932 = vmatpush3.msra.mxu1 %v55_v13 }
 0x12a   :  { %1842 = vmatmul.mubr.msk.f32.gmra.mxu1 %vm363_vm2, %v358_v11  ;;  %1933 = vmatprep.subr.mxu1 %v2046_v1 }
 0x12b   :  { %1943 = vmatprep.mubr.msk.f32.mxu1 %vm2047_vm0, %v2046_v1  ;;  %1934 = vmatpush3.msra.mxu1 %v54_v14 }
 0x12c   :  { %1935 = vmatprep.subr.mxu1 %v2046_v1 }
 0x12d   :  { %1936 = vmatpush3.msra.mxu1 %v53_v15 }
 0x12e   :  { %1937 = vmatprep.subr.mxu1 %v2046_v1 }
 0x12f   :  { %1938 = vmatpush3.msra.mxu1 %v52_v16 }
 0x130   :  { %1939 = vmatprep.subr.mxu1 %v2046_v1 }
 0x131   :  { %1940 = vmatpush3.msra.mxu1 %v51_v17 }
 0x132   :  { %1941 = vmatprep.subr.mxu1 %v2046_v1 }
 0x133   :  { %1942 = vmatpush3.msra.mxu1 %v50_v18 }
 0x18a   :  { %v505_v20 = vpop.f32.mrf.mxu1 }
 0x18b   :  { %v506_v21 = vadd.f32 %v2406_v19, %v505_v20 }
 0x18c   :  { %v1771_v22 = vpop.f32.mrf.mxu1 }
 0x18d   :  { %v629_v23 = vmax.f32 %v506_v21, 0.0 }
 0x18e   :  { %v510_v24 = vpop.f32.mrf.mxu1 }
 0x18f   :  { %v511_v25 = vadd.f32 %v2406_v19, %v510_v24  ;;  %1853 = vmatmul.mubr.msk.f32.vlgmr.msra.gmra.mxu0 %vm363_vm2, %v629_v23 }
 0x190   :  { %v1774_v26 = vpop.f32.mrf.mxu1  ;;  %1855 = vmatprep.mubr.msk.f32.mxu0 %vm2047_vm0, %v2046_v1 }
 0x191   :  { %v630_v27 = vmax.f32 %v511_v25, 0.0 }
 0x192   :  { %v515_v28 = vpop.f32.mrf.mxu1 }
 0x193   :  { %v516_v29 = vadd.f32 %v2406_v19, %v515_v28  ;;  %1856 = vmatmul.mubr.msk.f32.gmra.mxu0 %vm363_vm2, %v630_v27 }
 0x194   :  { %v1777_v30 = vpop.f32.mrf.mxu1  ;;  %1858 = vmatprep.mubr.msk.f32.mxu0 %vm2047_vm0, %v2046_v1 }
 0x195   :  { %v631_v31 = vmax.f32 %v516_v29, 0.0 }
 0x196   :  { %v520_v32 = vpop.f32.mrf.mxu1 }
 0x197   :  { %v521_v33 = vadd.f32 %v2406_v19, %v520_v32  ;;  %1859 = vmatmul.mubr.msk.f32.gmra.mxu0 %vm363_vm2, %v631_v31 }
 0x198   :  { %v1780_v34 = vpop.f32.mrf.mxu1  ;;  %1861 = vmatprep.mubr.msk.f32.mxu0 %vm2047_vm0, %v2046_v1 }
 0x199   :  { %v632_v35 = vmax.f32 %v521_v33, 0.0 }
 0x19a   :  { %v525_v37 = vpop.f32.mrf.mxu1 }
 0x19b   :  { %v526_v38 = vadd.f32 %v2406_v19, %v525_v37  ;;  %1862 = vmatmul.mubr.msk.f32.gmra.mxu0 %vm363_vm2, %v632_v35 }
 0x19c   :  { %v1783_v39 = vpop.f32.mrf.mxu1  ;;  %1864 = vmatprep.mubr.msk.f32.mxu0 %vm2047_vm0, %v2046_v1 }
 0x19d   :  { %v633_v40 = vmax.f32 %v526_v38, 0.0 }
 0x19e   :  { %v530_v41 = vpop.f32.mrf.mxu1 }
 0x19f   :  { %v531_v42 = vadd.f32 %v2406_v19, %v530_v41  ;;  %1865 = vmatmul.mubr.msk.f32.gmra.mxu0 %vm363_vm2, %v633_v40 }
 0x1a0   :  { %v1786_v43 = vpop.f32.mrf.mxu1  ;;  %1867 = vmatprep.mubr.msk.f32.mxu0 %vm2047_vm0, %v2046_v1 }
 0x1a1   :  { %v634_v44 = vmax.f32 %v531_v42, 0.0 }
 0x1a2   :  { %v535_v45 = vpop.f32.mrf.mxu1 }
 0x1a3   :  { %v536_v46 = vadd.f32 %v2406_v19, %v535_v45  ;;  %1868 = vmatmul.mubr.msk.f32.gmra.mxu0 %vm363_vm2, %v634_v44 }
 0x1a4   :  { %v1789_v47 = vpop.f32.mrf.mxu1  ;;  %1870 = vmatprep.mubr.msk.f32.mxu0 %vm2047_vm0, %v2046_v1 }
 0x1a5   :  { %v635_v48 = vmax.f32 %v536_v46, 0.0 }
 0x1a6   :  { %v540_v49 = vpop.f32.mrf.mxu1 }
 0x1a7   :  { %v541_v50 = vadd.f32 %v2406_v19, %v540_v49  ;;  %1871 = vmatmul.mubr.msk.f32.gmra.mxu0 %vm363_vm2, %v635_v48 }
 0x1a8   :  { %v1792_v51 = vpop.f32.mrf.mxu1  ;;  %1873 = vmatprep.mubr.msk.f32.mxu0 %vm2047_vm0, %v2046_v1 }
 0x1a9   :  { %v636_v52 = vmax.f32 %v541_v50, 0.0 }
 0x1aa   :  { %v545_v53 = vpop.f32.mrf.mxu1 }
 0x1ab   :  { %v546_v54 = vadd.f32 %v2406_v19, %v545_v53  ;;  %1874 = vmatmul.mubr.msk.f32.gmra.mxu0 %vm363_vm2, %v636_v52 }
 0x1ac   :  { %v1795_v55 = vpop.f32.mrf.mxu1  ;;  %1876 = vmatprep.mubr.msk.f32.mxu0 %vm2047_vm0, %v2046_v1 }
 0x1ad   :  { %v637_v56 = vmax.f32 %v546_v54, 0.0 }
 0x1ae   :  { %v550_v57 = vpop.f32.mrf.mxu1 }
 0x1af   :  { %v551_v58 = vadd.f32 %v2406_v19, %v550_v57  ;;  %1877 = vmatmul.mubr.msk.f32.gmra.mxu0 %vm363_vm2, %v637_v56 }
 0x1b0   :  { %v1798_v59 = vpop.f32.mrf.mxu1  ;;  %1879 = vmatprep.mubr.msk.f32.mxu0 %vm2047_vm0, %v2046_v1 }
 0x1b1   :  { %v638_v60 = vmax.f32 %v551_v58, 0.0  ;;  %v2510_v59 = vld [vmem:[%s2740_s2 + $0x2] ss:$0 sm:$0xff] }
 0x1b2   :  { %v555_v61 = vpop.f32.mrf.mxu1 }
 0x1b3   :  { %v556_v62 = vadd.f32 %v2406_v19, %v555_v61  ;;  %1880 = vmatmul.mubr.msk.f32.gmra.mxu0 %vm363_vm2, %v638_v60 }
 0x1b4   :  { %v1801_v63 = vpop.f32.mrf.mxu1  ;;  %1882 = vmatprep.mubr.msk.f32.mxu0 %vm2047_vm0, %v2046_v1 }
 0x1b5   :  { %v639_v0 = vmax.f32 %v556_v62, 0.0 }
 0x1b6   :  { %v560_v2 = vpop.f32.mrf.mxu1 }
 0x1b7   :  { %v561_v3 = vadd.f32 %v2406_v19, %v560_v2  ;;  %1883 = vmatmul.mubr.msk.f32.gmra.mxu0 %vm363_vm2, %v639_v0 }
 0x1b8   :  { %v1804_v4 = vpop.f32.mrf.mxu1  ;;  %1885 = vmatprep.mubr.msk.f32.mxu0 %vm2047_vm0, %v2046_v1 }
 0x1b9   :  { %v640_v5 = vmax.f32 %v561_v3, 0.0 }
 0x1ba   :  { %v565_v6 = vpop.f32.mrf.mxu1 }
 0x1bb   :  { %v566_v7 = vadd.f32 %v2406_v19, %v565_v6  ;;  %1886 = vmatmul.mubr.msk.f32.gmra.mxu0 %vm363_vm2, %v640_v5 }
 0x1bc   :  { %v1807_v8 = vpop.f32.mrf.mxu1  ;;  %1888 = vmatprep.mubr.msk.f32.mxu0 %vm2047_vm0, %v2046_v1 }
 0x1bd   :  { %v641_v9 = vmax.f32 %v566_v7, 0.0 }
 0x1be   :  { %v570_v10 = vpop.f32.mrf.mxu1 }
 0x1bf   :  { %v571_v11 = vadd.f32 %v2406_v19, %v570_v10  ;;  %1889 = vmatmul.mubr.msk.f32.gmra.mxu0 %vm363_vm2, %v641_v9 }
 0x1c0   :  { %v1810_v12 = vpop.f32.mrf.mxu1  ;;  %1891 = vmatprep.mubr.msk.f32.mxu0 %vm2047_vm0, %v2046_v1 }
 0x1c1   :  { %v642_v36 = vmax.f32 %v571_v11, 0.0 }
 0x1c2   :  { %v575_v13 = vpop.f32.mrf.mxu1 }
 0x1c3   :  { %v576_v14 = vadd.f32 %v2406_v19, %v575_v13  ;;  %1892 = vmatmul.mubr.msk.f32.gmra.mxu0 %vm363_vm2, %v642_v36 }
 0x1c4   :  { %v1813_v15 = vpop.f32.mrf.mxu1  ;;  %1894 = vmatprep.mubr.msk.f32.mxu0 %vm2047_vm0, %v2046_v1 }
 0x1c5   :  { %v643_v16 = vmax.f32 %v576_v14, 0.0 }
 0x1c6   :  { %v580_v17 = vpop.f32.mrf.mxu1 }
 0x1c7   :  { %v581_v18 = vadd.f32 %v2406_v19, %v580_v17  ;;  %1895 = vmatmul.mubr.msk.f32.gmra.mxu0 %vm363_vm2, %v643_v16 }
 0x1c8   :  { %v1816_v20 = vpop.f32.mrf.mxu1  ;;  %1897 = vmatprep.mubr.msk.f32.mxu0 %vm2047_vm0, %v2046_v1 }
 0x1c9   :  { %v644_v21 = vmax.f32 %v581_v18, 0.0 }
 0x1ca   :  { %v585_v22 = vpop.f32.mrf.mxu1 }
 0x1cb   :  { %1898 = vmatmul.mubr.msk.f32.gmra.mxu0 %vm363_vm2, %v644_v21  ;;  %v586_v23 = vadd.f32 %v2406_v19, %v585_v22 }
 0x1cc   :  { %v1819_v24 = vpop.f32.mrf.mxu1  ;;  %1900 = vmatprep.mubr.msk.f32.mxu0 %vm2047_vm0, %v2046_v1 }
 0x1cd   :  { %v645_v25 = vmax.f32 %v586_v23, 0.0 }
 0x1ce   :  { %v590_v26 = vpop.f32.mrf.mxu1 }
 0x1cf   :  { %v591_v27 = vadd.f32 %v2406_v19, %v590_v26  ;;  %1901 = vmatmul.mubr.msk.f32.gmra.mxu0 %vm363_vm2, %v645_v25 }
 0x1d0   :  { %v1822_v28 = vpop.f32.mrf.mxu1  ;;  %1903 = vmatprep.mubr.msk.f32.mxu0 %vm2047_vm0, %v2046_v1 }
 0x1d1   :  { %v646_v29 = vmax.f32 %v591_v27, 0.0 }
 0x1d2   :  { %v595_v30 = vpop.f32.mrf.mxu1 }
 0x1d3   :  { %v596_v31 = vadd.f32 %v2406_v19, %v595_v30  ;;  %1904 = vmatmul.mubr.msk.f32.gmra.mxu0 %vm363_vm2, %v646_v29 }
 0x1d4   :  { %v1825_v32 = vpop.f32.mrf.mxu1  ;;  %1906 = vmatprep.mubr.msk.f32.mxu0 %vm2047_vm0, %v2046_v1 }
 0x1d5   :  { %v647_v33 = vmax.f32 %v596_v31, 0.0 }
 0x1d6   :  { %v600_v34 = vpop.f32.mrf.mxu1 }
 0x1d7   :  { %v601_v35 = vadd.f32 %v2406_v19, %v600_v34  ;;  %1907 = vmatmul.mubr.msk.f32.gmra.mxu0 %vm363_vm2, %v647_v33 }
 0x1d8   :  { %v1828_v37 = vpop.f32.mrf.mxu1  ;;  %1909 = vmatprep.mubr.msk.f32.mxu0 %vm2047_vm0, %v2046_v1 }
 0x1d9   :  { %v648_v38 = vmax.f32 %v601_v35, 0.0 }
 0x1da   :  { %v605_v39 = vpop.f32.mrf.mxu1 }
 0x1db   :  { %v606_v40 = vadd.f32 %v2406_v19, %v605_v39  ;;  %1910 = vmatmul.mubr.msk.f32.gmra.mxu0 %vm363_vm2, %v648_v38 }
 0x1dc   :  { %v1831_v41 = vpop.f32.mrf.mxu1  ;;  %1912 = vmatprep.mubr.msk.f32.mxu0 %vm2047_vm0, %v2046_v1 }
 0x1dd   :  { %v649_v42 = vmax.f32 %v606_v40, 0.0 }
 0x1de   :  { %v610_v43 = vpop.f32.mrf.mxu1 }
 0x1df   :  { %v611_v44 = vadd.f32 %v2406_v19, %v610_v43  ;;  %1913 = vmatmul.mubr.msk.f32.gmra.mxu0 %vm363_vm2, %v649_v42 }
 0x1e0   :  { %v1834_v45 = vpop.f32.mrf.mxu1  ;;  %1915 = vmatprep.mubr.msk.f32.mxu0 %vm2047_vm0, %v2046_v1 }
 0x1e1   :  { %v650_v46 = vmax.f32 %v611_v44, 0.0 }
 0x1e2   :  { %v615_v47 = vpop.f32.mrf.mxu1 }
 0x1e3   :  { %v616_v48 = vadd.f32 %v2406_v19, %v615_v47  ;;  %1916 = vmatmul.mubr.msk.f32.gmra.mxu0 %vm363_vm2, %v650_v46 }
 0x1e4   :  { %v1837_v49 = vpop.f32.mrf.mxu1  ;;  %1918 = vmatprep.mubr.msk.f32.mxu0 %vm2047_vm0, %v2046_v1 }
 0x1e5   :  { %v651_v50 = vmax.f32 %v616_v48, 0.0 }
 0x1e6   :  { %v620_v51 = vpop.f32.mrf.mxu1 }
 0x1e7   :  { %v621_v52 = vadd.f32 %v2406_v19, %v620_v51  ;;  %1919 = vmatmul.mubr.msk.f32.gmra.mxu0 %vm363_vm2, %v651_v50 }
 0x1e8   :  { %v1840_v53 = vpop.f32.mrf.mxu1  ;;  %1921 = vmatprep.mubr.msk.f32.mxu0 %vm2047_vm0, %v2046_v1 }
 0x1e9   :  { %v652_v54 = vmax.f32 %v621_v52, 0.0 }
 0x1ea   :  { %v625_v55 = vpop.f32.mrf.mxu1 }
 0x1eb   :  { %v626_v56 = vadd.f32 %v2406_v19, %v625_v55  ;;  %1922 = vmatmul.mubr.msk.f32.gmra.mxu0 %vm363_vm2, %v652_v54 }
 0x1ec   :  { %v1843_v57 = vpop.f32.mrf.mxu1  ;;  %1924 = vmatprep.mubr.msk.f32.mxu0 %vm2047_vm0, %v2046_v1 }
 0x1ed   :  { %v653_v58 = vmax.f32 %v626_v56, 0.0 }
 0x1ef   :  { %1925 = vmatmul.mubr.msk.f32.gmra.mxu0 %vm363_vm2, %v653_v58 }
 0x1f0   :  { %1390 = vmatprep.mubr.f32.mxu0 %v2046_v1 }
 0x24f   :  { %v799_v60 = vpop.f32.mrf.mxu0 }
 0x250   :  { %v800_v61 = vadd.f32 %v2510_v59, %v799_v60 }
 0x251   :  { %v1854_v19 = vpop.f32.mrf.mxu0 }
 0x252   :  { %v923_v62 = vmax.f32 %v800_v61, 0.0 }
 0x253   :  { %v804_v63 = vpop.f32.mrf.mxu0 }
 0x254   :  { %v805_v0 = vadd.f32 %v2510_v59, %v804_v63  ;;  %1944 = vmatmul.mubr.msk.f32.vlgmr.msra.gmra.mxu1 %vm952_vm3, %v923_v62 }
 0x255   :  { %v1857_v2 = vpop.f32.mrf.mxu0  ;;  %1946 = vmatprep.mubr.msk.f32.mxu1 %vm2047_vm0, %v2046_v1 }
 0x256   :  { %v924_v3 = vmax.f32 %v805_v0, 0.0 }
 0x257   :  { %v809_v4 = vpop.f32.mrf.mxu0 }
 0x258   :  { %v810_v5 = vadd.f32 %v2510_v59, %v809_v4  ;;  %1947 = vmatmul.mubr.msk.f32.gmra.mxu1 %vm952_vm3, %v924_v3 }
 0x259   :  { %v1860_v6 = vpop.f32.mrf.mxu0  ;;  %1949 = vmatprep.mubr.msk.f32.mxu1 %vm2047_vm0, %v2046_v1 }
 0x25a   :  { %v925_v7 = vmax.f32 %v810_v5, 0.0 }
 0x25b   :  { %v814_v8 = vpop.f32.mrf.mxu0 }
 0x25c   :  { %v815_v9 = vadd.f32 %v2510_v59, %v814_v8  ;;  %1950 = vmatmul.mubr.msk.f32.gmra.mxu1 %vm952_vm3, %v925_v7 }
 0x25d   :  { %v1863_v10 = vpop.f32.mrf.mxu0  ;;  %1952 = vmatprep.mubr.msk.f32.mxu1 %vm2047_vm0, %v2046_v1 }
 0x25e   :  { %v926_v11 = vmax.f32 %v815_v9, 0.0 }
 0x25f   :  { %v819_v12 = vpop.f32.mrf.mxu0 }
 0x260   :  { %v820_v36 = vadd.f32 %v2510_v59, %v819_v12  ;;  %1953 = vmatmul.mubr.msk.f32.gmra.mxu1 %vm952_vm3, %v926_v11 }
 0x261   :  { %v1866_v13 = vpop.f32.mrf.mxu0  ;;  %1955 = vmatprep.mubr.msk.f32.mxu1 %vm2047_vm0, %v2046_v1 }
 0x262   :  { %v927_v14 = vmax.f32 %v820_v36, 0.0 }
 0x263   :  { %v824_v15 = vpop.f32.mrf.mxu0 }
 0x264   :  { %v825_v16 = vadd.f32 %v2510_v59, %v824_v15  ;;  %1956 = vmatmul.mubr.msk.f32.gmra.mxu1 %vm952_vm3, %v927_v14 }
 0x265   :  { %v1869_v17 = vpop.f32.mrf.mxu0  ;;  %1958 = vmatprep.mubr.msk.f32.mxu1 %vm2047_vm0, %v2046_v1 }
 0x266   :  { %v928_v18 = vmax.f32 %v825_v16, 0.0 }
 0x267   :  { %v829_v20 = vpop.f32.mrf.mxu0 }
 0x268   :  { %v830_v21 = vadd.f32 %v2510_v59, %v829_v20  ;;  %1959 = vmatmul.mubr.msk.f32.gmra.mxu1 %vm952_vm3, %v928_v18 }
 0x269   :  { %v1872_v22 = vpop.f32.mrf.mxu0  ;;  %1961 = vmatprep.mubr.msk.f32.mxu1 %vm2047_vm0, %v2046_v1 }
 0x26a   :  { %v929_v23 = vmax.f32 %v830_v21, 0.0 }
 0x26b   :  { %v834_v24 = vpop.f32.mrf.mxu0 }
 0x26c   :  { %v835_v25 = vadd.f32 %v2510_v59, %v834_v24  ;;  %1962 = vmatmul.mubr.msk.f32.gmra.mxu1 %vm952_vm3, %v929_v23 }
 0x26d   :  { %v1875_v26 = vpop.f32.mrf.mxu0  ;;  %1964 = vmatprep.mubr.msk.f32.mxu1 %vm2047_vm0, %v2046_v1 }
 0x26e   :  { %v930_v27 = vmax.f32 %v835_v25, 0.0 }
 0x26f   :  { %v839_v28 = vpop.f32.mrf.mxu0 }
 0x270   :  { %v840_v29 = vadd.f32 %v2510_v59, %v839_v28  ;;  %1965 = vmatmul.mubr.msk.f32.gmra.mxu1 %vm952_vm3, %v930_v27 }
 0x271   :  { %v1878_v30 = vpop.f32.mrf.mxu0  ;;  %1967 = vmatprep.mubr.msk.f32.mxu1 %vm2047_vm0, %v2046_v1 }
 0x272   :  { %v931_v31 = vmax.f32 %v840_v29, 0.0 }
 0x273   :  { %v844_v32 = vpop.f32.mrf.mxu0 }
 0x274   :  { %v845_v33 = vadd.f32 %v2510_v59, %v844_v32  ;;  %1968 = vmatmul.mubr.msk.f32.gmra.mxu1 %vm952_vm3, %v931_v31 }
 0x275   :  { %v1881_v34 = vpop.f32.mrf.mxu0  ;;  %1970 = vmatprep.mubr.msk.f32.mxu1 %vm2047_vm0, %v2046_v1 }
 0x276   :  { %v932_v35 = vmax.f32 %v845_v33, 0.0 }
 0x277   :  { %v849_v37 = vpop.f32.mrf.mxu0 }
 0x278   :  { %v850_v38 = vadd.f32 %v2510_v59, %v849_v37  ;;  %1971 = vmatmul.mubr.msk.f32.gmra.mxu1 %vm952_vm3, %v932_v35 }
 0x279   :  { %v1884_v39 = vpop.f32.mrf.mxu0  ;;  %1973 = vmatprep.mubr.msk.f32.mxu1 %vm2047_vm0, %v2046_v1 }
 0x27a   :  { %v933_v40 = vmax.f32 %v850_v38, 0.0 }
 0x27b   :  { %v854_v41 = vpop.f32.mrf.mxu0 }
 0x27c   :  { %v855_v42 = vadd.f32 %v2510_v59, %v854_v41  ;;  %1974 = vmatmul.mubr.msk.f32.gmra.mxu1 %vm952_vm3, %v933_v40 }
 0x27d   :  { %v1887_v43 = vpop.f32.mrf.mxu0  ;;  %1976 = vmatprep.mubr.msk.f32.mxu1 %vm2047_vm0, %v2046_v1 }
 0x27e   :  { %v934_v44 = vmax.f32 %v855_v42, 0.0 }
 0x27f   :  { %v859_v45 = vpop.f32.mrf.mxu0 }
 0x280   :  { %v860_v46 = vadd.f32 %v2510_v59, %v859_v45  ;;  %1977 = vmatmul.mubr.msk.f32.gmra.mxu1 %vm952_vm3, %v934_v44 }
 0x281   :  { %v1890_v47 = vpop.f32.mrf.mxu0  ;;  %1979 = vmatprep.mubr.msk.f32.mxu1 %vm2047_vm0, %v2046_v1 }
 0x282   :  { %v935_v48 = vmax.f32 %v860_v46, 0.0 }
 0x283   :  { %v864_v49 = vpop.f32.mrf.mxu0 }
 0x284   :  { %v865_v50 = vadd.f32 %v2510_v59, %v864_v49  ;;  %1980 = vmatmul.mubr.msk.f32.gmra.mxu1 %vm952_vm3, %v935_v48 }
 0x285   :  { %v1893_v51 = vpop.f32.mrf.mxu0  ;;  %1982 = vmatprep.mubr.msk.f32.mxu1 %vm2047_vm0, %v2046_v1 }
 0x286   :  { %v936_v52 = vmax.f32 %v865_v50, 0.0 }
 0x287   :  { %v869_v53 = vpop.f32.mrf.mxu0 }
 0x288   :  { %v870_v54 = vadd.f32 %v2510_v59, %v869_v53  ;;  %1983 = vmatmul.mubr.msk.f32.gmra.mxu1 %vm952_vm3, %v936_v52  ;;  %v62_v53 = vld [vmem:[%s2740_s2 + $0x4] sm:$0x1] }
 0x289   :  { %v1896_v55 = vpop.f32.mrf.mxu0  ;;  %1985 = vmatprep.mubr.msk.f32.mxu1 %vm2047_vm0, %v2046_v1 }
 0x28a   :  { %v937_v56 = vmax.f32 %v870_v54, 0.0  ;;  %v2048_v54 = vmov 0  }
 0x28b   :  { %v874_v57 = vpop.f32.mrf.mxu0  ;;  %2023 = vset.pattern.permute.xlu0 %v2048_v54 }
 0x28c   :  { %v875_v58 = vadd.f32 %v2510_v59, %v874_v57  ;;  %1986 = vmatmul.mubr.msk.f32.gmra.mxu1 %vm952_vm3, %v937_v56  ;;  %1245 = vperm.xlu0 %2023, %v62_v53  }
 0x28d   :  { %v1899_v60 = vpop.f32.mrf.mxu0  ;;  %1988 = vmatprep.mubr.msk.f32.mxu1 %vm2047_vm0, %v2046_v1 }
 0x28e   :  { %v938_v61 = vmax.f32 %v875_v58, 0.0 }
 0x28f   :  { %v879_v19 = vpop.f32.mrf.mxu0 }
 0x290   :  { %1989 = vmatmul.mubr.msk.f32.gmra.mxu1 %vm952_vm3, %v938_v61  ;;  %v880_v62 = vadd.f32 %v2510_v59, %v879_v19 }
 0x291   :  { %v1902_v63 = vpop.f32.mrf.mxu0  ;;  %1991 = vmatprep.mubr.msk.f32.mxu1 %vm2047_vm0, %v2046_v1 }
 0x292   :  { %v939_v0 = vmax.f32 %v880_v62, 0.0 }
 0x293   :  { %v884_v2 = vpop.f32.mrf.mxu0 }
 0x294   :  { %v885_v3 = vadd.f32 %v2510_v59, %v884_v2  ;;  %1992 = vmatmul.mubr.msk.f32.gmra.mxu1 %vm952_vm3, %v939_v0 }
 0x295   :  { %v1905_v4 = vpop.f32.mrf.mxu0  ;;  %1994 = vmatprep.mubr.msk.f32.mxu1 %vm2047_vm0, %v2046_v1 }
 0x296   :  { %v940_v5 = vmax.f32 %v885_v3, 0.0  ;;  %v2632_v3 = vld [vmem:[%s2740_s2 + $0x3] ss:$0 sm:$0xff] }
 0x297   :  { %v889_v6 = vpop.f32.mrf.mxu0 }
 0x298   :  { %v890_v7 = vadd.f32 %v2510_v59, %v889_v6  ;;  %1995 = vmatmul.mubr.msk.f32.gmra.mxu1 %vm952_vm3, %v940_v5 }
 0x299   :  { %v1908_v8 = vpop.f32.mrf.mxu0  ;;  %1997 = vmatprep.mubr.msk.f32.mxu1 %vm2047_vm0, %v2046_v1 }
 0x29a   :  { %v941_v9 = vmax.f32 %v890_v7, 0.0 }
 0x29b   :  { %v894_v10 = vpop.f32.mrf.mxu0 }
 0x29c   :  { %v895_v11 = vadd.f32 %v2510_v59, %v894_v10  ;;  %1998 = vmatmul.mubr.msk.f32.gmra.mxu1 %vm952_vm3, %v941_v9 }
 0x29d   :  { %v1911_v12 = vpop.f32.mrf.mxu0  ;;  %2000 = vmatprep.mubr.msk.f32.mxu1 %vm2047_vm0, %v2046_v1 }
 0x29e   :  { %v942_v36 = vmax.f32 %v895_v11, 0.0 }
 0x29f   :  { %v899_v13 = vpop.f32.mrf.mxu0 }
 0x2a0   :  { %v900_v14 = vadd.f32 %v2510_v59, %v899_v13  ;;  %2001 = vmatmul.mubr.msk.f32.gmra.mxu1 %vm952_vm3, %v942_v36 }
 0x2a1   :  { %v1914_v15 = vpop.f32.mrf.mxu0  ;;  %2003 = vmatprep.mubr.msk.f32.mxu1 %vm2047_vm0, %v2046_v1 }
 0x2a2   :  { %v943_v16 = vmax.f32 %v900_v14, 0.0 }
 0x2a3   :  { %v904_v17 = vpop.f32.mrf.mxu0 }
 0x2a4   :  { %v905_v18 = vadd.f32 %v2510_v59, %v904_v17  ;;  %2004 = vmatmul.mubr.msk.f32.gmra.mxu1 %vm952_vm3, %v943_v16 }
 0x2a5   :  { %v1917_v20 = vpop.f32.mrf.mxu0  ;;  %2006 = vmatprep.mubr.msk.f32.mxu1 %vm2047_vm0, %v2046_v1 }
 0x2a6   :  { %v944_v21 = vmax.f32 %v905_v18, 0.0 }
 0x2a7   :  { %v909_v22 = vpop.f32.mrf.mxu0 }
 0x2a8   :  { %v910_v23 = vadd.f32 %v2510_v59, %v909_v22  ;;  %2007 = vmatmul.mubr.msk.f32.gmra.mxu1 %vm952_vm3, %v944_v21 }
 0x2a9   :  { %v1920_v24 = vpop.f32.mrf.mxu0  ;;  %2009 = vmatprep.mubr.msk.f32.mxu1 %vm2047_vm0, %v2046_v1 }
 0x2aa   :  { %v945_v25 = vmax.f32 %v910_v23, 0.0 }
 0x2ab   :  { %v914_v26 = vpop.f32.mrf.mxu0 }
 0x2ac   :  { %v915_v27 = vadd.f32 %v2510_v59, %v914_v26  ;;  %2010 = vmatmul.mubr.msk.f32.gmra.mxu1 %vm952_vm3, %v945_v25 }
 0x2ad   :  { %v1923_v28 = vpop.f32.mrf.mxu0  ;;  %2012 = vmatprep.mubr.msk.f32.mxu1 %vm2047_vm0, %v2046_v1 }
 0x2ae   :  { %v946_v29 = vmax.f32 %v915_v27, 0.0 }
 0x2af   :  { %v919_v30 = vpop.f32.mrf.mxu0 }
 0x2b0   :  { %v920_v31 = vadd.f32 %v2510_v59, %v919_v30  ;;  %2013 = vmatmul.mubr.msk.f32.gmra.mxu1 %vm952_vm3, %v946_v29 }
 0x2b1   :  { %v1926_v32 = vpop.f32.mrf.mxu0  ;;  %2015 = vmatprep.mubr.msk.f32.mxu1 %vm2047_vm0, %v2046_v1 }
 0x2b2   :  { %v947_v33 = vmax.f32 %v920_v31, 0.0 }
 0x2b4   :  { %2016 = vmatmul.mubr.msk.f32.gmra.mxu1 %vm952_vm3, %v947_v33 }
 0x314   :  { %v2610_v34 = vpop.f32.mrf.mxu1 }
 0x316   :  { %v1945_v35 = vpop.f32.mrf.mxu1 }
 0x318   :  { %v2612_v37 = vpop.f32.mrf.mxu1 }
 0x31a   :  { %v1948_v38 = vpop.f32.mrf.mxu1 }
 0x31c   :  { %v2614_v39 = vpop.f32.mrf.mxu1 }
 0x31e   :  { %v1951_v40 = vpop.f32.mrf.mxu1 }
 0x320   :  { %v2616_v41 = vpop.f32.mrf.mxu1 }
 0x322   :  { %v1954_v59 = vpop.f32.mrf.mxu1 }
 0x324   :  { %v2618_v42 = vpop.f32.mrf.mxu1 }
 0x326   :  { %v1957_v43 = vpop.f32.mrf.mxu1 }
 0x328   :  { %v2620_v44 = vpop.f32.mrf.mxu1 }
 0x32a   :  { %v1960_v45 = vpop.f32.mrf.mxu1 }
 0x32c   :  { %v2622_v46 = vpop.f32.mrf.mxu1 }
 0x32d   :  { %v1125_v45 = vadd.f32 %v2632_v3, %v2622_v46  ;;  %v1110_v46 = vadd.f32 %v2632_v3, %v2616_v41  ;;  %v1095_v41 = vadd.f32 %v2632_v3, %v2610_v34 }
 0x32e   :  { %v1963_v47 = vpop.f32.mrf.mxu1 }
 0x330   :  { %v2624_v48 = vpop.f32.mrf.mxu1 }
 0x331   :  { %v1130_v38 = vadd.f32 %v2632_v3, %v2624_v48  ;;  %v1120_v48 = vadd.f32 %v2632_v3, %v2620_v44  ;;  %v1105_v44 = vadd.f32 %v2632_v3, %v2614_v39 }
 0x332   :  { %v1966_v49 = vpop.f32.mrf.mxu1 }
 0x333   :  { %v1225_v47 = vmax.f32 %v1130_v38, 0.0  ;;  %v1223_v53 = vmax.f32 %v1120_v48, 0.0 }
 0x334   :  { %v1134_v50 = vpop.f32.mrf.mxu1 }
 0x335   :  { %v1135_v31 = vadd.f32 %v2632_v3, %v1134_v50 }
 0x336   :  { %v1969_v51 = vpop.f32.mrf.mxu1 }
 0x337   :  { %v1226_v40 = vmax.f32 %v1135_v31, 0.0  ;;  %v1224_v51 = vmax.f32 %v1125_v45, 0.0 }
 0x338   :  { %v1139_v52 = vpop.f32.mrf.mxu1 }
 0x339   :  { %v1140_v27 = vadd.f32 %v2632_v3, %v1139_v52  ;;  %v1115_v52 = vadd.f32 %v2632_v3, %v2618_v42  ;;  %v1100_v42 = vadd.f32 %v2632_v3, %v2612_v37 }
 0x33a   :  { %v1972_v55 = vpop.f32.mrf.mxu1 }
 0x33b   :  { %v1227_v32 = vmax.f32 %v1140_v27, 0.0  ;;  %v1222_v54 = vmax.f32 %v1115_v52, 0.0  ;;  %v1221_v55 = vmax.f32 %v1110_v46, 0.0 }
 0x33c   :  { %v1144_v56 = vpop.f32.mrf.mxu1 }
 0x33d   :  { %v1145_v23 = vadd.f32 %v2632_v3, %v1144_v56  ;;  %v1220_v56 = vmax.f32 %v1105_v44, 0.0 }
 0x33e   :  { %v1975_v57 = vpop.f32.mrf.mxu1 }
 0x33f   :  { %v1228_v28 = vmax.f32 %v1145_v23, 0.0  ;;  %v1219_v57 = vmax.f32 %v1100_v42, 0.0 }
 0x340   :  { %v1149_v58 = vpop.f32.mrf.mxu1 }
 0x341   :  { %v1150_v18 = vadd.f32 %v2632_v3, %v1149_v58  ;;  %v1218_v58 = vmax.f32 %v1095_v41, 0.0 }
 0x342   :  { %v1978_v60 = vpop.f32.mrf.mxu1 }
 0x343   :  { %v1229_v24 = vmax.f32 %v1150_v18, 0.0 }
 0x344   :  { %v1154_v61 = vpop.f32.mrf.mxu1 }
 0x345   :  { %v1155_v14 = vadd.f32 %v2632_v3, %v1154_v61 }
 0x346   :  { %v1981_v19 = vpop.f32.mrf.mxu1 }
 0x347   :  { %v1230_v20 = vmax.f32 %v1155_v14, 0.0 }
 0x348   :  { %v1159_v62 = vpop.f32.mrf.mxu1 }
 0x349   :  { %v1160_v11 = vadd.f32 %v2632_v3, %v1159_v62 }
 0x34a   :  { %v1984_v63 = vpop.f32.mrf.mxu1 }
 0x34b   :  { %v1231_v15 = vmax.f32 %v1160_v11, 0.0 }
 0x34c   :  { %v1164_v0 = vpop.f32.mrf.mxu1 }
 0x34d   :  { %v1165_v7 = vadd.f32 %v2632_v3, %v1164_v0 }
 0x34e   :  { %v1987_v2 = vpop.f32.mrf.mxu1 }
 0x34f   :  { %v1232_v12 = vmax.f32 %v1165_v7, 0.0 }
 0x350   :  { %v1169_v4 = vpop.f32.mrf.mxu1 }
 0x351   :  { %v1170_v5 = vadd.f32 %v2632_v3, %v1169_v4 }
 0x352   :  { %v1990_v6 = vpop.f32.mrf.mxu1 }
 0x353   :  { %v1233_v8 = vmax.f32 %v1170_v5, 0.0 }
 0x354   :  { %v2636_v9 = vpop.f32.mrf.mxu1 }
 0x355   :  { %1538 = vmatpush1.xpose.msk.msra.mxu0 %vm363_vm2, %v1233_v8 }
 0x356   :  { %1328 = vmatprep.subr.mxu0 %v2046_v1  ;;  %v1993_v10 = vpop.f32.mrf.mxu1 }
 0x357   :  { %v1175_v10 = vadd.f32 %v2632_v3, %v2636_v9  ;;  %v1246_v9 = vpop.permute.xlu0 %1245 }
 0x358   :  { %v2641_v36 = vpop.f32.mrf.mxu1 }
 0x359   :  { %1539 = vmatpush1.xpose.msk.msra.mxu0 %vm363_vm2, %v1232_v12  ;;  %v1180_v7 = vadd.f32 %v2632_v3, %v2641_v36  ;;  %v1234_v12 = vmax.f32 %v1175_v10, 0.0  ;;  %v63_v36 = vld [vmem:[%s2740_s2 + $0x5] sm:$0x1]  ;;  %s2024_s2 = scalar_lea.vmem %s1427_s27, 32 }
 0x35a   :  { %1330 = vmatprep.subr.mxu0 %v2046_v1  ;;  %v1996_v13 = vpop.f32.mrf.mxu1  ;;  %p2025_p0 = scmp.ne.s32.totalorder %s1427_s27, %s2024_s2  ;;  %p2030_p2 = scmp.lt.s32.totalorder %s2024_s2, %s2024_s2 }
 0x35b   :  { %v1235_v11 = vmax.f32 %v1180_v7, 0.0  ;;  %v2049_v13 = vmov 1966171168  }
 0x35c   :  { %v2646_v16 = vpop.f32.mrf.mxu1  ;;  %v1401_v14 = vunpack.c.l.s4 %v2049_v13  ;;  %p2031_p3 = por %p2030_p2, %p2029_p1 }
 0x35d   :  { %1540 = vmatpush1.xpose.msk.msra.mxu0 %vm363_vm2, %v1231_v15  ;;  %v1185_v5 = vadd.f32 %v2632_v3, %v2646_v16  ;;  %v1403_v15 = vlaneseq }
 0x35e   :  { %1332 = vmatprep.subr.mxu0 %v2046_v1  ;;  %v1999_v17 = vpop.f32.mrf.mxu1  ;;  %v1402_v16 = vunpack.c.0.s8 %v1401_v14  ;;  %p2032_p4 = pnand %p2031_p3, %p2025_p0 }
 0x35f   :  { %v1236_v8 = vmax.f32 %v1185_v5, 0.0  ;;  %v1404_v17 = vshrl.u32 %v1403_v15, 7  ;;  %vm1417_vm4 = vcmp.lt.s32.totalorder %v1403_v15, 200 }
 0x360   :  { %v2651_v21 = vpop.f32.mrf.mxu1 }
 0x361   :  { %1541 = vmatpush1.xpose.msk.msra.mxu0 %vm363_vm2, %v1230_v20  ;;  %v1190_v2 = vadd.f32 %v2632_v3, %v2651_v21 }
 0x362   :  { %1334 = vmatprep.subr.mxu0 %v2046_v1  ;;  %v2002_v22 = vpop.f32.mrf.mxu1 }
 0x363   :  { %v1237_v6 = vmax.f32 %v1190_v2, 0.0 }
 0x364   :  { %v2656_v25 = vpop.f32.mrf.mxu1 }
 0x365   :  { %1542 = vmatpush1.xpose.msk.msra.mxu0 %vm363_vm2, %v1229_v24  ;;  %v1195_v63 = vadd.f32 %v2632_v3, %v2656_v25 }
 0x366   :  { %1336 = vmatprep.subr.mxu0 %v2046_v1  ;;  %v2005_v26 = vpop.f32.mrf.mxu1 }
 0x367   :  { %v1238_v4 = vmax.f32 %v1195_v63, 0.0 }
 0x368   :  { %v1199_v29 = vpop.f32.mrf.mxu1 }
 0x369   :  { %1543 = vmatpush1.xpose.msk.msra.mxu0 %vm363_vm2, %v1228_v28  ;;  %v1200_v19 = vadd.f32 %v2632_v3, %v1199_v29 }
 0x36a   :  { %1338 = vmatprep.subr.mxu0 %v2046_v1  ;;  %v2008_v30 = vpop.f32.mrf.mxu1 }
 0x36b   :  { %v1239_v0 = vmax.f32 %v1200_v19, 0.0 }
 0x36c   :  { %v1204_v33 = vpop.f32.mrf.mxu1 }
 0x36d   :  { %1544 = vmatpush1.xpose.msk.msra.mxu0 %vm363_vm2, %v1227_v32  ;;  %v1205_v34 = vadd.f32 %v2632_v3, %v1204_v33 }
 0x36e   :  { %1340 = vmatprep.subr.mxu0 %v2046_v1  ;;  %v2011_v35 = vpop.f32.mrf.mxu1 }
 0x36f   :  { %v1240_v62 = vmax.f32 %v1205_v34, 0.0 }
 0x370   :  { %v1209_v59 = vpop.f32.mrf.mxu1 }
 0x371   :  { %1545 = vmatpush1.xpose.msk.msra.mxu0 %vm363_vm2, %v1226_v40  ;;  %v1210_v37 = vadd.f32 %v2632_v3, %v1209_v59 }
 0x372   :  { %1342 = vmatprep.subr.mxu0 %v2046_v1  ;;  %v2014_v43 = vpop.f32.mrf.mxu1 }
 0x373   :  { %v1241_v61 = vmax.f32 %v1210_v37, 0.0 }
 0x374   :  { %v1214_v49 = vpop.f32.mrf.mxu1 }
 0x375   :  { %1546 = vmatpush1.xpose.msk.msra.mxu0 %vm363_vm2, %v1225_v47  ;;  %v1215_v39 = vadd.f32 %v2632_v3, %v1214_v49 }
 0x376   :  { %1344 = vmatprep.subr.mxu0 %v2046_v1  ;;  %v2017_v50 = vpop.f32.mrf.mxu1 }
 0x377   :  { %v1242_v60 = vmax.f32 %v1215_v39, 0.0 }
 0x379   :  { %1547 = vmatpush1.xpose.msk.msra.mxu0 %vm363_vm2, %v1224_v51 }
 0x37a   :  { %1346 = vmatprep.subr.mxu0 %v2046_v1 }
 0x37d   :  { %1548 = vmatpush1.xpose.msk.msra.mxu0 %vm363_vm2, %v1223_v53 }
 0x37e   :  { %1348 = vmatprep.subr.mxu0 %v2046_v1 }
 0x381   :  { %1549 = vmatpush1.xpose.msk.msra.mxu0 %vm363_vm2, %v1222_v54 }
 0x382   :  { %1350 = vmatprep.subr.mxu0 %v2046_v1 }
 0x385   :  { %1550 = vmatpush1.xpose.msk.msra.mxu0 %vm363_vm2, %v1221_v55 }
 0x386   :  { %1352 = vmatprep.subr.mxu0 %v2046_v1 }
 0x389   :  { %1551 = vmatpush1.xpose.msk.msra.mxu0 %vm363_vm2, %v1220_v56 }
 0x38a   :  { %1354 = vmatprep.subr.mxu0 %v2046_v1 }
 0x38d   :  { %1552 = vmatpush1.xpose.msk.msra.mxu0 %vm363_vm2, %v1219_v57 }
 0x38e   :  { %1356 = vmatprep.subr.mxu0 %v2046_v1 }
 0x391   :  { %1553 = vmatpush1.xpose.msk.msra.mxu0 %vm363_vm2, %v1218_v58 }
 0x392   :  { %1372 = vmatprep.subr.mxu0 %v2046_v1 }
 0x395   :  { %1554 = vmatpush2.xpose.msk.msra.mxu0 %vm363_vm2, %v1242_v60 }
 0x396   :  { %1374 = vmatprep.subr.mxu0 %v2046_v1 }
 0x399   :  { %1555 = vmatpush2.xpose.msk.msra.mxu0 %vm363_vm2, %v1241_v61 }
 0x39a   :  { %1376 = vmatprep.subr.mxu0 %v2046_v1 }
 0x39d   :  { %1556 = vmatpush2.xpose.msk.msra.mxu0 %vm363_vm2, %v1240_v62 }
 0x39e   :  { %1378 = vmatprep.subr.mxu0 %v2046_v1 }
 0x3a1   :  { %1557 = vmatpush2.xpose.msk.msra.mxu0 %vm363_vm2, %v1239_v0 }
 0x3a2   :  { %1380 = vmatprep.subr.mxu0 %v2046_v1 }
 0x3a5   :  { %1558 = vmatpush2.xpose.msk.msra.mxu0 %vm363_vm2, %v1238_v4 }
 0x3a6   :  { %1382 = vmatprep.subr.mxu0 %v2046_v1 }
 0x3a9   :  { %1559 = vmatpush2.xpose.msk.msra.mxu0 %vm363_vm2, %v1237_v6 }
 0x3aa   :  { %1384 = vmatprep.subr.mxu0 %v2046_v1 }
 0x3ad   :  { %1560 = vmatpush2.xpose.msk.msra.mxu0 %vm363_vm2, %v1236_v8 }
 0x3ae   :  { %1386 = vmatprep.subr.mxu0 %v2046_v1 }
 0x3b1   :  { %1561 = vmatpush2.xpose.msk.msra.mxu0 %vm363_vm2, %v1235_v11 }
 0x3b2   :  { %1388 = vmatprep.subr.mxu0 %v2046_v1  ;;  %v1405_v1 = vsub.s32 %v1402_v16, %v1404_v17 }
 0x3b5   :  { %1562 = vmatpush2.xpose.msk.msra.mxu0 %vm363_vm2, %v1234_v12 }
 0x3b8   :  { %1563 = vmatmul.mubr.msk.f32.vlgmr.msra.gmra.mxu0 %vm363_vm2, %v63_v36 }
 0x478   :  { %v1392_v3 = vpop.f32.mrf.mxu0 }
 0x479   :  { %v1393_v20 = vadd.f32 %v1392_v3, %v1246_v9 }
 0x47a   :  { %v1394_v18 = vpop.f32.mrf.mxu0 }
 0x47b   :  { %v1395_v21 = vadd.f32 %v1394_v18, %v1246_v9 }
 0x47d   :  { %v1399_v22 = vcombine.low %v1393_v20, %v1395_v21 }
 0x47f   :  { %v1406_v23 = vrot.slane %v1399_v22, %v1405_v1 }
 0x481   :  { %v1413_v24 = vrot.slane %v1406_v23, %v1405_v1 }
 0x483   :  { %1419 = vst.msk [vmem:[#allocation2] sm:$0x3] %vm1417_vm4, %v1413_v24 }
 0x484   :  { %2035 = shalt.err (!%p2032_p4)
}
 0x485   :  { %1429 = dma.vmem_to_hbm [thread:$0]  %s1427_s27, 32, %s2741_s3, [#allocation3]  }
 0x486   :  { %2044 = dma.done.wait [#allocation3], 32  }
 0x487   :  { %2045 = vsyncadd [#allocation3], 4294967264 }
 0x488   :  { %1433 = vsyncpa [#allocation3], 1 }

</bundles_post_ra>
